<compile_context>
chip_gen: v7x
topology: tpu7x:2x2x1
jax: 0.10.0
libtpu: 0.0.40
codegen_flags: <defaults>
</compile_context>

<pallas_src>
import functools

import jax
import jax.numpy as jnp
from jax.experimental import pallas as pl
from jax.experimental.pallas import tpu as pltpu

IN_DIM = 4
HIDDEN = 128
OUT_DIM = 2
K_PAD = 8      # fc1 contraction dim padded 4 -> 8 (once, in the wrapper)
OUT_PAD = 8    # fc2 output rows padded 2 -> 8 (once, in the wrapper)


def _policy_kernel(xt_ref, w1_ref, b1_ref, w2_ref, b2_ref, out_ref,
                   m_ref, l_ref, *, valid_b):
    # xt : (K_PAD, B_TILE)    input tile, batch on lanes (K zero-padded)
    # w1 : (128, K_PAD)       fc1 weight, K zero-padded
    # b1 : (128, 1)           fc1 bias (column)
    # w2 : (OUT_PAD, 128)     fc2 weight, rows >= 2 are zero
    # b2 : (OUT_PAD, 1)       fc2 bias (column), rows >= 2 are zero
    # out: (2, B_TILE)        probabilities, lane-dense store
    # m_ref, l_ref: (OUT_PAD, 1) running max / running sum (VMEM scratch)
    p = pl.program_id(0)          # 0 = stats pass, 1 = normalize pass
    j = pl.program_id(1)          # batch-tile index
    b_tile = xt_ref.shape[1]

    # ---- fc1 + ReLU on the MXU: h_t[c, b] = relu(b1[c] + sum_k w1[c,k] x[b,k])
    h_t = jnp.dot(w1_ref[...], xt_ref[...],
                  preferred_element_type=jnp.float32,
                  precision=jax.lax.Precision.HIGHEST)          # (128, B_TILE)
    h_t = jnp.maximum(h_t + b1_ref[...], 0.0)

    # ---- fc2 on the MXU (K = 128 contraction): rows >= 2 are zero padding.
    logits = jnp.dot(w2_ref[...], h_t,
                     preferred_element_type=jnp.float32,
                     precision=jax.lax.Precision.HIGHEST)       # (OUT_PAD, B_TILE)
    logits = logits + b2_ref[...]

    # Mask lanes beyond the true batch size (B padded to a multiple of B_TILE).
    lane_ids = jax.lax.broadcasted_iota(jnp.int32, (1, b_tile), 1) + j * b_tile
    valid = lane_ids < valid_b                                  # (1, B_TILE)

    @pl.when(p == 0)
    def _stats_pass():
        @pl.when(j == 0)
        def _init():
            m_ref[...] = jnp.full(m_ref.shape, -jnp.inf, dtype=m_ref.dtype)
            l_ref[...] = jnp.zeros(l_ref.shape, dtype=l_ref.dtype)

        masked = jnp.where(valid, logits, -jnp.inf)
        m_old = m_ref[...]
        m_new = jnp.maximum(m_old, jnp.max(masked, axis=-1, keepdims=True))
        e = jnp.where(valid, jnp.exp(logits - m_new), 0.0)
        l_ref[...] = l_ref[...] * jnp.exp(m_old - m_new) + jnp.sum(
            e, axis=-1, keepdims=True)
        m_ref[...] = m_new
        # This block is revisited (fully overwritten) in pass 1; write zeros so
        # the pass-0 writeback is deterministic.
        out_ref[...] = jnp.zeros_like(out_ref)

    @pl.when(p == 1)
    def _normalize_pass():
        inv_l = 1.0 / l_ref[...]                                # exact, (OUT_PAD, 1)
        probs = jnp.exp(logits - m_ref[...]) * inv_l
        probs = jnp.where(valid, probs, 0.0)
        out_ref[...] = probs[:out_ref.shape[0], :].astype(out_ref.dtype)


def policy_forward(x, w1, b1, w2, b2):
    """Forward pass matching Policy.forward.

    x : (B, 4)    float32 input
    w1: (128, 4)  fc1.weight (PyTorch layout)
    b1: (128,)    fc1.bias
    w2: (2, 128)  fc2.weight (PyTorch layout)
    b2: (2,)      fc2.bias
    returns (B, 2) probabilities, softmax taken over dim=0 (the batch axis).
    """
    B, in_dim = x.shape
    hid = w1.shape[0]
    out_dim = w2.shape[0]

    # Batch tile: multiple of 128 lanes; 512 (multiple of 256 -> full v6e MXU
    # columns) for large B.  Per-step working set stays far under the 16/32 MiB
    # scoped limits and v7x's 64 MiB physical VMEM.
    if B > 512:
        b_tile = 512
    else:
        b_tile = 128 * pl.cdiv(B, 128)
    b_pad = b_tile * pl.cdiv(B, b_tile)
    nb = b_pad // b_tile

    # Single fused pad+transpose producing the lane-dense (K_PAD, B_pad) slab
    # (the pad of K and B is required regardless; no extra HBM round trip).
    xt = jnp.pad(x.astype(jnp.float32),
                 ((0, b_pad - B), (0, K_PAD - in_dim))).T        # (8, B_pad)
    # Weight padding done once here, not per tile.
    w1p = jnp.pad(w1.astype(jnp.float32), ((0, 0), (0, K_PAD - in_dim)))   # (128, 8)
    b1c = b1.astype(jnp.float32).reshape(hid, 1)                            # (128, 1)
    w2p = jnp.pad(w2.astype(jnp.float32), ((0, OUT_PAD - out_dim), (0, 0)))  # (8, 128)
    b2c = jnp.pad(b2.astype(jnp.float32), (0, OUT_PAD - out_dim)).reshape(OUT_PAD, 1)

    kernel = functools.partial(_policy_kernel, valid_b=B)

    out_t = pl.pallas_call(
        kernel,
        out_shape=jax.ShapeDtypeStruct((out_dim, b_pad), jnp.float32),
        grid=(2, nb),
        in_specs=[
            pl.BlockSpec((K_PAD, b_tile), lambda p, j: (0, j)),   # x tile
            pl.BlockSpec((hid, K_PAD), lambda p, j: (0, 0)),      # w1 (resident)
            pl.BlockSpec((hid, 1), lambda p, j: (0, 0)),          # b1 (resident)
            pl.BlockSpec((OUT_PAD, hid), lambda p, j: (0, 0)),    # w2 (resident)
            pl.BlockSpec((OUT_PAD, 1), lambda p, j: (0, 0)),      # b2 (resident)
        ],
        out_specs=pl.BlockSpec((out_dim, b_tile), lambda p, j: (0, j)),
        scratch_shapes=[
            pltpu.VMEM((OUT_PAD, 1), jnp.float32),   # running max
            pltpu.VMEM((OUT_PAD, 1), jnp.float32),   # running sum
        ],
        compiler_params=pltpu.CompilerParams(
            # Both passes share the online-softmax scratch state, so both grid
            # axes must preserve order.
            dimension_semantics=("arbitrary", "arbitrary"),
            vmem_limit_bytes=16 * 1024 * 1024,
        ),
    )(xt, w1p, b1c, w2p, b2c)

    # Small fused slice+transpose back to the PyTorch (B, 2) layout.
    return out_t[:, :B].T


def init_params(key, in_dim=IN_DIM, hidden=HIDDEN, out_dim=OUT_DIM):
    # Deterministic init mimicking nn.Linear's U(-1/sqrt(fan_in), +1/sqrt(fan_in)),
    # stored in PyTorch (out, in) layout.
    k1, k2, k3, k4 = jax.random.split(key, 4)
    bound1 = 1.0 / jnp.sqrt(jnp.float32(in_dim))
    bound2 = 1.0 / jnp.sqrt(jnp.float32(hidden))
    w1 = jax.random.uniform(k1, (hidden, in_dim), jnp.float32, -bound1, bound1)
    b1 = jax.random.uniform(k2, (hidden,), jnp.float32, -bound1, bound1)
    w2 = jax.random.uniform(k3, (out_dim, hidden), jnp.float32, -bound2, bound2)
    b2 = jax.random.uniform(k4, (out_dim,), jnp.float32, -bound2, bound2)
    return w1, b1, w2, b2


def policy_forward_ref(x, w1, b1, w2, b2):
    h = jnp.maximum(x @ w1.T + b1, 0.0)
    logits = h @ w2.T + b2
    return jax.nn.softmax(logits, axis=0)


if __name__ == "__main__":
    key = jax.random.PRNGKey(0)
    k_params, k_x = jax.random.split(key)

    B = 8
    w1, b1, w2, b2 = init_params(k_params)
    x = jax.random.normal(k_x, (B, IN_DIM), jnp.float32)

    out = jax.block_until_ready(policy_forward(x, w1, b1, w2, b2))
    ref = policy_forward_ref(x, w1, b1, w2, b2)

    assert out.shape == (B, OUT_DIM)
    assert jnp.allclose(out, ref, atol=1e-4, rtol=1e-4), "mismatch vs JAX reference"
    # columns of a dim=0 softmax each sum to ~1
    assert jnp.allclose(jnp.sum(out, axis=0), jnp.ones((OUT_DIM,)), atol=1e-4)

    # TODO(synk): Policy.put_data/train (Adam update, Categorical sampling) are
    # host-side RL bookkeeping outside the forward pass and are not kernelized.
    print("KERNEL_OK")
</pallas_src>

<mosaic_0001>
module attributes {stable_mosaic.version = 11 : i64} {
  func.func @_policy_kernel(%arg0: i32, %arg1: i32, %arg2: memref<8x128xf32, #tpu.memory_space<vmem>>, %arg3: memref<128x8xf32, #tpu.memory_space<vmem>>, %arg4: memref<128x1xf32, #tpu.memory_space<vmem>>, %arg5: memref<8x128xf32, #tpu.memory_space<vmem>>, %arg6: memref<8x1xf32, #tpu.memory_space<vmem>>, %arg7: memref<2x128xf32, #tpu.memory_space<vmem>>, %arg8: memref<8x1xf32, #tpu.memory_space<vmem>>, %arg9: memref<8x1xf32, #tpu.memory_space<vmem>>) attributes {dimension_semantics = [#tpu.dimension_semantics<arbitrary>, #tpu.dimension_semantics<arbitrary>], iteration_bounds = array<i64: 2, 1>, scalar_prefetch = 0 : i64, scratch_operands = 2 : i64, tpu.core_type = #tpu.core_type<tc>, window_params = [{transform_indices = @transform_0, window_bounds = array<i64: 8, 128>}, {pipeline_mode = #tpu.pipeline_mode<synchronous>, transform_indices = @transform_1, window_bounds = array<i64: 128, 8>}, {pipeline_mode = #tpu.pipeline_mode<synchronous>, transform_indices = @transform_2, window_bounds = array<i64: 128, 1>}, {pipeline_mode = #tpu.pipeline_mode<synchronous>, transform_indices = @transform_3, window_bounds = array<i64: 8, 128>}, {pipeline_mode = #tpu.pipeline_mode<synchronous>, transform_indices = @transform_4, window_bounds = array<i64: 8, 1>}, {transform_indices = @transform_5, window_bounds = array<i64: 2, 128>}]} {
    %c0 = arith.constant 0 : index
    %c0_0 = arith.constant 0 : index
    %0 = vector.load %arg3[%c0, %c0_0] : memref<128x8xf32, #tpu.memory_space<vmem>>, vector<128x8xf32>
    %c0_1 = arith.constant 0 : index
    %c0_2 = arith.constant 0 : index
    %1 = vector.load %arg2[%c0_1, %c0_2] : memref<8x128xf32, #tpu.memory_space<vmem>>, vector<8x128xf32>
    %cst = arith.constant dense<0.000000e+00> : vector<128x128xf32>
    %2 = tpu.matmul %0, %1, %cst {dimension_numbers = #tpu.dot_dimension_numbers<[1], [0], [0], [1], [0, 0, 1, 1], [], []>, precision = #tpu.contract_precision<fp32>} : vector<128x8xf32>, vector<8x128xf32>, vector<128x128xf32> -> vector<128x128xf32>
    %c0_3 = arith.constant 0 : index
    %c0_4 = arith.constant 0 : index
    %3 = vector.load %arg4[%c0_3, %c0_4] : memref<128x1xf32, #tpu.memory_space<vmem>>, vector<128x1xf32>
    %4 = vector.broadcast %3 : vector<128x1xf32> to vector<128x128xf32>
    %5 = arith.addf %2, %4 : vector<128x128xf32>
    %cst_5 = arith.constant 0.000000e+00 : f32
    %6 = vector.broadcast %cst_5 : f32 to vector<128x128xf32>
    %7 = arith.maximumf %5, %6 : vector<128x128xf32>
    %c0_6 = arith.constant 0 : index
    %c0_7 = arith.constant 0 : index
    %8 = vector.load %arg5[%c0_6, %c0_7] : memref<8x128xf32, #tpu.memory_space<vmem>>, vector<8x128xf32>
    %cst_8 = arith.constant dense<0.000000e+00> : vector<8x128xf32>
    %9 = tpu.matmul %8, %7, %cst_8 {dimension_numbers = #tpu.dot_dimension_numbers<[1], [0], [0], [1], [0, 0, 1, 1], [], []>, precision = #tpu.contract_precision<fp32>} : vector<8x128xf32>, vector<128x128xf32>, vector<8x128xf32> -> vector<8x128xf32>
    %c0_9 = arith.constant 0 : index
    %c0_10 = arith.constant 0 : index
    %10 = vector.load %arg6[%c0_9, %c0_10] : memref<8x1xf32, #tpu.memory_space<vmem>>, vector<8x1xf32>
    %11 = vector.broadcast %10 : vector<8x1xf32> to vector<8x128xf32>
    %12 = arith.addf %9, %11 : vector<8x128xf32>
    %13 = tpu.iota {dimensions = array<i32: 1>} : vector<1x128xi32>
    %c128_i32 = arith.constant 128 : i32
    %14 = arith.muli %arg1, %c128_i32 : i32
    %15 = vector.broadcast %14 : i32 to vector<1x128xi32>
    %16 = arith.addi %13, %15 : vector<1x128xi32>
    %c8_i32 = arith.constant 8 : i32
    %17 = vector.broadcast %c8_i32 : i32 to vector<1x128xi32>
    %18 = arith.cmpi slt, %16, %17 : vector<1x128xi32>
    %c0_i32 = arith.constant 0 : i32
    %19 = arith.cmpi eq, %arg0, %c0_i32 : i32
    %20 = arith.extui %19 : i1 to i32
    %c0_i32_11 = arith.constant 0 : i32
    %21 = arith.cmpi ne, %20, %c0_i32_11 : i32
    scf.if %21 {
      %c0_i32_13 = arith.constant 0 : i32
      %25 = arith.cmpi eq, %arg1, %c0_i32_13 : i32
      %26 = arith.extui %25 : i1 to i32
      %c0_i32_14 = arith.constant 0 : i32
      %27 = arith.cmpi ne, %26, %c0_i32_14 : i32
      scf.if %27 {
        %cst_30 = arith.constant 0xFF800000 : f32
        %54 = vector.broadcast %cst_30 : f32 to vector<8x1xf32>
        %c0_31 = arith.constant 0 : index
        %c0_32 = arith.constant 0 : index
        %55 = vector.load %arg8[%c0_31, %c0_32] : memref<8x1xf32, #tpu.memory_space<vmem>>, vector<8x1xf32>
        tpu.vector_store %arg8[%c0_31, %c0_32], %54 {strides = array<i32>} : memref<8x1xf32, #tpu.memory_space<vmem>>, vector<8x1xf32>,
        %cst_33 = arith.constant 0.000000e+00 : f32
        %56 = vector.broadcast %cst_33 : f32 to vector<8x1xf32>
        %c0_34 = arith.constant 0 : index
        %c0_35 = arith.constant 0 : index
        %57 = vector.load %arg9[%c0_34, %c0_35] : memref<8x1xf32, #tpu.memory_space<vmem>>, vector<8x1xf32>
        tpu.vector_store %arg9[%c0_34, %c0_35], %56 {strides = array<i32>} : memref<8x1xf32, #tpu.memory_space<vmem>>, vector<8x1xf32>,
      } else {
      }
      %cst_15 = arith.constant 0xFF800000 : f32
      %28 = vector.shape_cast %18 : vector<1x128xi1> to vector<1x128xi1>
      %29 = vector.broadcast %28 : vector<1x128xi1> to vector<8x128xi1>
      %30 = vector.broadcast %cst_15 : f32 to vector<8x128xf32>
      %31 = arith.select %29, %12, %30 : vector<8x128xi1>, vector<8x128xf32>
      %c0_16 = arith.constant 0 : index
      %c0_17 = arith.constant 0 : index
      %32 = vector.load %arg8[%c0_16, %c0_17] : memref<8x1xf32, #tpu.memory_space<vmem>>, vector<8x1xf32>
      %cst_18 = arith.constant dense<0xFF800000> : vector<8xf32>
      %33 = vector.multi_reduction <maximumf>, %31, %cst_18 [1] : vector<8x128xf32> to vector<8xf32>
      %34 = vector.shape_cast %33 : vector<8xf32> to vector<8x1xf32>
      %35 = arith.maximumf %32, %34 : vector<8x1xf32>
      %36 = vector.broadcast %35 : vector<8x1xf32> to vector<8x128xf32>
      %37 = arith.subf %12, %36 : vector<8x128xf32>
      %38 = math.exp %37 : vector<8x128xf32>
      %cst_19 = arith.constant 0.000000e+00 : f32
      %39 = vector.shape_cast %18 : vector<1x128xi1> to vector<1x128xi1>
      %40 = vector.broadcast %39 : vector<1x128xi1> to vector<8x128xi1>
      %41 = vector.broadcast %cst_19 : f32 to vector<8x128xf32>
      %42 = arith.select %40, %38, %41 : vector<8x128xi1>, vector<8x128xf32>
      %c0_20 = arith.constant 0 : index
      %c0_21 = arith.constant 0 : index
      %43 = vector.load %arg9[%c0_20, %c0_21] : memref<8x1xf32, #tpu.memory_space<vmem>>, vector<8x1xf32>
      %44 = arith.subf %32, %35 : vector<8x1xf32>
      %45 = math.exp %44 : vector<8x1xf32>
      %46 = arith.mulf %43, %45 : vector<8x1xf32>
      %cst_22 = arith.constant dense<0.000000e+00> : vector<8xf32>
      %47 = vector.multi_reduction <add>, %42, %cst_22 [1] : vector<8x128xf32> to vector<8xf32>
      %48 = vector.shape_cast %47 : vector<8xf32> to vector<8x1xf32>
      %49 = arith.addf %46, %48 : vector<8x1xf32>
      %c0_23 = arith.constant 0 : index
      %c0_24 = arith.constant 0 : index
      %50 = vector.load %arg9[%c0_23, %c0_24] : memref<8x1xf32, #tpu.memory_space<vmem>>, vector<8x1xf32>
      tpu.vector_store %arg9[%c0_23, %c0_24], %49 {strides = array<i32>} : memref<8x1xf32, #tpu.memory_space<vmem>>, vector<8x1xf32>,
      %c0_25 = arith.constant 0 : index
      %c0_26 = arith.constant 0 : index
      %51 = vector.load %arg8[%c0_25, %c0_26] : memref<8x1xf32, #tpu.memory_space<vmem>>, vector<8x1xf32>
      tpu.vector_store %arg8[%c0_25, %c0_26], %35 {strides = array<i32>} : memref<8x1xf32, #tpu.memory_space<vmem>>, vector<8x1xf32>,
      %cst_27 = arith.constant 0.000000e+00 : f32
      %52 = vector.broadcast %cst_27 : f32 to vector<2x128xf32>
      %c0_28 = arith.constant 0 : index
      %c0_29 = arith.constant 0 : index
      %53 = vector.load %arg7[%c0_28, %c0_29] : memref<2x128xf32, #tpu.memory_space<vmem>>, vector<2x128xf32>
      tpu.vector_store %arg7[%c0_28, %c0_29], %52 {strides = array<i32>} : memref<2x128xf32, #tpu.memory_space<vmem>>, vector<2x128xf32>,
    } else {
    }
    %c1_i32 = arith.constant 1 : i32
    %22 = arith.cmpi eq, %arg0, %c1_i32 : i32
    %23 = arith.extui %22 : i1 to i32
    %c0_i32_12 = arith.constant 0 : i32
    %24 = arith.cmpi ne, %23, %c0_i32_12 : i32
    scf.if %24 {
      %c0_13 = arith.constant 0 : index
      %c0_14 = arith.constant 0 : index
      %25 = vector.load %arg9[%c0_13, %c0_14] : memref<8x1xf32, #tpu.memory_space<vmem>>, vector<8x1xf32>
      %cst_15 = arith.constant 1.000000e+00 : f32
      %26 = vector.broadcast %cst_15 : f32 to vector<8x1xf32>
      %27 = arith.divf %26, %25 : vector<8x1xf32>
      %c0_16 = arith.constant 0 : index
      %c0_17 = arith.constant 0 : index
      %28 = vector.load %arg8[%c0_16, %c0_17] : memref<8x1xf32, #tpu.memory_space<vmem>>, vector<8x1xf32>
      %29 = vector.broadcast %28 : vector<8x1xf32> to vector<8x128xf32>
      %30 = arith.subf %12, %29 : vector<8x128xf32>
      %31 = math.exp %30 : vector<8x128xf32>
      %32 = vector.broadcast %27 : vector<8x1xf32> to vector<8x128xf32>
      %33 = arith.mulf %31, %32 : vector<8x128xf32>
      %cst_18 = arith.constant 0.000000e+00 : f32
      %34 = vector.shape_cast %18 : vector<1x128xi1> to vector<1x128xi1>
      %35 = vector.broadcast %34 : vector<1x128xi1> to vector<8x128xi1>
      %36 = vector.broadcast %cst_18 : f32 to vector<8x128xf32>
      %37 = arith.select %35, %33, %36 : vector<8x128xi1>, vector<8x128xf32>
      %38 = vector.extract_strided_slice %37 {offsets = [0, 0], sizes = [2, 128], strides = [1, 1]} : vector<8x128xf32> to vector<2x128xf32>
      %c0_19 = arith.constant 0 : index
      %c0_20 = arith.constant 0 : index
      %39 = vector.load %arg7[%c0_19, %c0_20] : memref<2x128xf32, #tpu.memory_space<vmem>>, vector<2x128xf32>
      tpu.vector_store %arg7[%c0_19, %c0_20], %38 {strides = array<i32>} : memref<2x128xf32, #tpu.memory_space<vmem>>, vector<2x128xf32>,
    } else {
    }
    return
  }
  func.func @transform_0(%arg0: i32, %arg1: i32) -> (i32, i32) {
    %c0_i32 = arith.constant 0 : i32
    %c0_i32_0 = arith.constant 0 : i32
    return %c0_i32, %arg1 : i32, i32
  }
  func.func @transform_1(%arg0: i32, %arg1: i32) -> (i32, i32) {
    %c0_i32 = arith.constant 0 : i32
    %c0_i32_0 = arith.constant 0 : i32
    %c0_i32_1 = arith.constant 0 : i32
    return %c0_i32, %c0_i32_0 : i32, i32
  }
  func.func @transform_2(%arg0: i32, %arg1: i32) -> (i32, i32) {
    %c0_i32 = arith.constant 0 : i32
    %c0_i32_0 = arith.constant 0 : i32
    %c0_i32_1 = arith.constant 0 : i32
    return %c0_i32, %c0_i32_0 : i32, i32
  }
  func.func @transform_3(%arg0: i32, %arg1: i32) -> (i32, i32) {
    %c0_i32 = arith.constant 0 : i32
    %c0_i32_0 = arith.constant 0 : i32
    %c0_i32_1 = arith.constant 0 : i32
    return %c0_i32, %c0_i32_0 : i32, i32
  }
  func.func @transform_4(%arg0: i32, %arg1: i32) -> (i32, i32) {
    %c0_i32 = arith.constant 0 : i32
    %c0_i32_0 = arith.constant 0 : i32
    %c0_i32_1 = arith.constant 0 : i32
    return %c0_i32, %c0_i32_0 : i32, i32
  }
  func.func @transform_5(%arg0: i32, %arg1: i32) -> (i32, i32) {
    %c0_i32 = arith.constant 0 : i32
    %c0_i32_0 = arith.constant 0 : i32
    return %c0_i32, %arg1 : i32, i32
  }
}

</mosaic_0001>

<bundles_post_ra>
// kernel: tpu_custom_call.1
= control target key start
LH: loop header
LB: loop body
LE: loop exit
PB: predicated region body
PF: predicated region fallthrough
CT: control target
= control target key end

     0   :  { %10 = vsyncpa [#allocation5], 0  ;;  %s3250_s18 = smov 0   ;;  %s3252_s19 = smov 0   ;;  %s3972_s0 = inlined_call_operand.vmem [shape: f32[8,128], index: 0, kind: input, shape index: {}]   ;;  %s3973_s1 = inlined_call_operand.vmem [shape: f32[128,8], index: 1, kind: input, shape index: {}]   ;;  %s3974_s2 = inlined_call_operand.vmem [shape: f32[128,1], index: 2, kind: input, shape index: {}]   ;;  %s3975_s3 = inlined_call_operand.vmem [shape: f32[8,128], index: 3, kind: input, shape index: {}]   ;;  %s3976_s4 = inlined_call_operand.vmem [shape: f32[8,1], index: 4, kind: input, shape index: {}]   ;;  %s3977_s5 = inlined_call_operand.hbm [shape: f32[2,128], index: 5, kind: output, shape index: {}]  }
   0x1   :  { %s3254_s20 = smov 0  }
   0x2 LB: > { %s2275_s21 = sadd.s32 4294967295, %s3209_s20   ;;  %s28_s22 = sadd.s32 1, %s3205_s19  ;;  %s3209_s20 = sphi %s3254_s20, %s16_s20   ;;  %s3205_s19 = sphi %s3252_s19, %s3990_s19   ;;  %s3201_s18 = sphi %s3250_s18, %s3989_s18  }
   0x3   : > { %p30_p0 = scmp.ge.s32.totalorder %s28_s22, 2  ;;  %p2278_p1 = scmp.ge.s32.totalorder %s3209_s20, 1 }
   0x4   : > { %p199_p2 = scmp.lt.s32.totalorder %s3209_s20, 3 }
   0x5   : > { %s3992_s22 = smov (%p30_p0, %s28_s22), 0 }
   0x6   : > { %p200_p3 = pnand %p2278_p1, %p199_p2 }
   0x7   : > { %v241_v0 = vld [vmem:[%s3972_s0] sm:$0xff] (!%p200_p3)  ;;  %vm338_vm0 = vcmask (!%p200_p3), 64512   ;;  %v226_v2 = vld [vmem:[%s3973_s1 + $0x8] sm:$0xff] (!%p200_p3)  ;;  %v227_v6 = vld [vmem:[%s3973_s1 + $0x10] sm:$0xff] (!%p200_p3)  ;;  %vm3213_vm1 = vmmov (!%p200_p3), 0   ;;  %p2279_p4 = scmp.ne.s32.totalorder (!%p200_p3), %s3201_s18, 0 }
   0x8   : > { %203 = sbr.rel (%p200_p3) target bundleno = 1418 (0x58a), region = 40  ;;  %v225_v1 = vld [vmem:[%s3973_s1] sm:$0xff] (!%p200_p3)  ;;  %v3280_v3 = vand.u32 (!%p200_p3), 4294901760, %v241_v0  ;;  %v343_v5 = vsel (!%p200_p3), %vm338_vm0, %v226_v2, 0  ;;  %v228_v7 = vld [vmem:[%s3973_s1 + $0x18] sm:$0xff] (!%p200_p3)  ;;  %v346_v11 = vsel (!%p200_p3), %vm338_vm0, %v227_v6, 0 }
   0x9   : > { %v340_v4 = vsel (!%p200_p3), %vm338_vm0, %v225_v1, 0  ;;  %v229_v8 = vld [vmem:[%s3973_s1 + $0x20] sm:$0xff] (!%p200_p3)  ;;  %v3295_v10 = vand.u32 (!%p200_p3), 4294901760, %v343_v5  ;;  %v349_v12 = vsel (!%p200_p3), %vm338_vm0, %v228_v7, 0  ;;  %v230_v13 = vld [vmem:[%s3973_s1 + $0x28] sm:$0xff] (!%p200_p3)  ;;  %v3306_v15 = vand.u32 (!%p200_p3), 4294901760, %v346_v11 }
   0xa   : > { %v3293_v9 = vand.u32 (!%p200_p3), 4294901760, %v340_v4  ;;  %2489 = vmatprep.subr.mxu0 (!%p200_p3), %v3280_v3  ;;  %v3304_v14 = vsub.f32 (!%p200_p3), %v241_v0, %v3280_v3  ;;  %v3308_v16 = vand.u32 (!%p200_p3), 4294901760, %v349_v12  ;;  %v352_v17 = vsel (!%p200_p3), %vm338_vm0, %v229_v8, 0  ;;  %v231_v18 = vld [vmem:[%s3973_s1 + $0x30] sm:$0xff] (!%p200_p3)  ;;  %v232_v39 = vld [vmem:[%s3973_s1 + $0x38] sm:$0xff] (!%p200_p3)  ;;  %v233_v44 = vld [vmem:[%s3973_s1 + $0x40] sm:$0xff] (!%p200_p3) }
   0xb   : > { %2490 = vmatpush3.msra.mxu0 (!%p200_p3), %v3280_v3  ;;  %v3319_v20 = vsub.f32 (!%p200_p3), %v343_v5, %v3295_v10  ;;  %v3321_v21 = vand.u32 (!%p200_p3), 4294901760, %v352_v17  ;;  %v355_v22 = vsel (!%p200_p3), %vm338_vm0, %v230_v13, 0  ;;  %v3328_v24 = vsub.f32 (!%p200_p3), %v346_v11, %v3306_v15  ;;  %v234_v49 = vld [vmem:[%s3973_s1 + $0x48] sm:$0xff] (!%p200_p3)  ;;  %v235_v50 = vld [vmem:[%s3973_s1 + $0x50] sm:$0xff] (!%p200_p3)  ;;  %v236_v55 = vld [vmem:[%s3973_s1 + $0x58] sm:$0xff] (!%p200_p3) }
   0xc   : > { %v3316_v19 = vsub.f32 (!%p200_p3), %v340_v4, %v3293_v9  ;;  %v3325_v23 = vand.u32 (!%p200_p3), 4294901760, %v3304_v14  ;;  %v3331_v25 = vsub.f32 (!%p200_p3), %v349_v12, %v3308_v16  ;;  %v3333_v26 = vand.u32 (!%p200_p3), 4294901760, %v355_v22  ;;  %v237_v60 = vld [vmem:[%s3973_s1 + $0x60] sm:$0xff] (!%p200_p3)  ;;  %v238_v61 = vld [vmem:[%s3973_s1 + $0x68] sm:$0xff] (!%p200_p3)  ;;  %v239_v13 = vld [vmem:[%s3973_s1 + $0x70] sm:$0xff] (!%p200_p3) }
   0xd   : > { %v465_v28 = vand.u32 (!%p200_p3), 4294901760, %v3319_v20  ;;  %v3338_v29 = vsub.f32 (!%p200_p3), %v352_v17, %v3321_v21  ;;  %v358_v30 = vsel (!%p200_p3), %vm338_vm0, %v231_v18, 0  ;;  %v475_v32 = vand.u32 (!%p200_p3), 4294901760, %v3328_v24 }
   0xe   : > { %v455_v27 = vand.u32 (!%p200_p3), 4294901760, %v3316_v19  ;;  %v617_v31 = vsub.f32 (!%p200_p3), %v3304_v14, %v3325_v23  ;;  %v485_v33 = vand.u32 (!%p200_p3), 4294901760, %v3331_v25  ;;  %v3346_v34 = vsub.f32 (!%p200_p3), %v355_v22, %v3333_v26 }
   0xf   : > { %v466_v36 = vsub.f32 %v3319_v20, %v465_v28  ;;  %v495_v37 = vand.u32 4294901760, %v3338_v29  ;;  %v3355_v38 = vand.u32 4294901760, %v358_v30  ;;  %v476_v41 = vsub.f32 %v3328_v24, %v475_v32 }
  0x10   : > { %v456_v35 = vsub.f32 %v3316_v19, %v455_v27  ;;  %v618_v40 = vand.u32 4294901760, %v617_v31  ;;  %v486_v42 = vsub.f32 %v3331_v25, %v485_v33  ;;  %v505_v43 = vand.u32 4294901760, %v3346_v34 }
  0x11   : > { %v467_v46 = vand.u32 4294901760, %v466_v36  ;;  %v496_v47 = vsub.f32 %v3338_v29, %v495_v37  ;;  %v3374_v48 = vsub.f32 %v358_v30, %v3355_v38  ;;  %v477_v51 = vand.u32 4294901760, %v476_v41 }
  0x12   : > { %v457_v45 = vand.u32 4294901760, %v456_v35  ;;  %2515 = vmatprep.subr.mxu0 %v618_v40  ;;  %v487_v52 = vand.u32 4294901760, %v486_v42  ;;  %v506_v53 = vsub.f32 %v3346_v34, %v505_v43  ;;  %v361_v54 = vsel %vm338_vm0, %v232_v39, 0 }
  0x13   : > { %v497_v56 = vand.u32 4294901760, %v496_v47  ;;  %v515_v57 = vand.u32 4294901760, %v3374_v48  ;;  %v3390_v58 = vand.u32 4294901760, %v361_v54  ;;  %v364_v59 = vsel %vm338_vm0, %v233_v44, 0 }
  0x14   : > { %2491 = vmatprep.mubr.f32.mxu0 %v457_v45  ;;  %v507_v62 = vand.u32 4294901760, %v506_v53  ;;  %v3399_v63 = vand.u32 4294901760, %v364_v59  ;;  %v367_v0 = vsel %vm338_vm0, %v234_v49, 0  ;;  %v370_v1 = vsel %vm338_vm0, %v235_v50, 0  ;;  %v240_v49 = vld [vmem:[%s3973_s1 + $0x78] sm:$0xff] }
  0x15   : > { %2492 = vmatmul.mubr.f32.vlgmr.msra.gmra.mrb[0].mxu0 %v467_v46  ;;  %v516_v2 = vsub.f32 %v3374_v48, %v515_v57  ;;  %v3407_v4 = vsub.f32 %v361_v54, %v3390_v58  ;;  %v3409_v5 = vand.u32 4294901760, %v367_v0  ;;  %v3411_v6 = vand.u32 4294901760, %v370_v1 }
  0x16   : > { %2516 = vmatpush3.msra.mxu0 %v618_v40  ;;  %2494 = vmatprep.mubr.f32.mxu0 %v477_v51  ;;  %v3414_v7 = vsub.f32 %v364_v59, %v3399_v63  ;;  %v373_v8 = vsel %vm338_vm0, %v236_v55, 0  ;;  %v376_v11 = vsel %vm338_vm0, %v237_v60, 0  ;;  %v379_v12 = vsel %vm338_vm0, %v238_v61, 0 }
  0x17   : > { %2541 = vmatprep.subr.mxu0 %v3304_v14  ;;  %v517_v17 = vand.u32 4294901760, %v516_v2  ;;  %v525_v18 = vand.u32 4294901760, %v3407_v4  ;;  %v3425_v22 = vsub.f32 %v367_v0, %v3409_v5  ;;  %v3428_v30 = vsub.f32 %v370_v1, %v3411_v6 }
  0x18   : > { %v535_v31 = vand.u32 4294901760, %v3414_v7  ;;  %v3431_v35 = vand.u32 4294901760, %v373_v8  ;;  %v3433_v36 = vand.u32 4294901760, %v376_v11  ;;  %v3435_v39 = vand.u32 4294901760, %v379_v12 }
  0x19   : > { %2495 = vmatmul.mubr.f32.gmra.mrb[2].mxu0 %v487_v52  ;;  %v526_v40 = vsub.f32 %v3407_v4, %v525_v18  ;;  %v545_v41 = vand.u32 4294901760, %v3425_v22  ;;  %v555_v42 = vand.u32 4294901760, %v3428_v30  ;;  %v382_v44 = vsel %vm338_vm0, %v239_v13, 0 }
  0x1a   : > { %2497 = vmatprep.mubr.f32.mxu0 %v497_v56  ;;  %v536_v45 = vsub.f32 %v3414_v7, %v535_v31  ;;  %v3447_v46 = vsub.f32 %v373_v8, %v3431_v35  ;;  %v3450_v47 = vsub.f32 %v376_v11, %v3433_v36  ;;  %v3456_v50 = vsub.f32 %v379_v12, %v3435_v39 }
  0x1b   : > { %v3458_v51 = vand.u32 4294901760, %v382_v44  ;;  %v527_v52 = vand.u32 4294901760, %v526_v40  ;;  %v546_v53 = vsub.f32 %v3425_v22, %v545_v41  ;;  %v556_v54 = vsub.f32 %v3428_v30, %v555_v42 }
  0x1c   : > { %v565_v55 = vand.u32 4294901760, %v3447_v46  ;;  %v537_v56 = vand.u32 4294901760, %v536_v45  ;;  %v575_v59 = vand.u32 4294901760, %v3450_v47  ;;  %v385_v61 = vsel %vm338_vm0, %v240_v49, 0 }
  0x1d   : > { %2498 = vmatmul.mubr.f32.gmra.mrb[4].mxu0 %v507_v62  ;;  %v3469_v60 = vsub.f32 %v382_v44, %v3458_v51  ;;  %v3472_v62 = vand.u32 4294901760, %v385_v61  ;;  %v547_v0 = vand.u32 4294901760, %v546_v53  ;;  %v585_v2 = vand.u32 4294901760, %v3456_v50 }
  0x1e   : > { %2500 = vmatprep.mubr.f32.mxu0 %v517_v17  ;;  %v566_v1 = vsub.f32 %v3447_v46, %v565_v55  ;;  %v557_v11 = vand.u32 4294901760, %v556_v54  ;;  %v576_v12 = vsub.f32 %v3450_v47, %v575_v59  ;;  %vm2156_vm3 = vcmask (!%p2279_p4), 7168  }
  0x1f   : > { %v3479_v8 = vsub.f32 %v385_v61, %v3472_v62  ;;  %v595_v13 = vand.u32 4294901760, %v3469_v60  ;;  %v586_v40 = vsub.f32 %v3456_v50, %v585_v2  ;;  %v244_v61 = vld [vmem:[%s3974_s2 + $0x10] sm:$0xff] }
  0x20   : > { %v567_v17 = vand.u32 4294901760, %v566_v1  ;;  %v577_v45 = vand.u32 4294901760, %v576_v12  ;;  %v243_v1 = vld [vmem:[%s3974_s2 + $0x8] sm:$0xff]  ;;  %v246_v12 = vld [vmem:[%s3974_s2 + $0x20] sm:$0xff] }
  0x21   : > { %2501 = vmatmul.mubr.f32.gmra.mrb[6].mxu0 %v527_v52  ;;  %v605_v44 = vand.u32 4294901760, %v3479_v8  ;;  %v596_v49 = vsub.f32 %v3469_v60, %v595_v13  ;;  %v587_v52 = vand.u32 4294901760, %v586_v40  ;;  %v248_v40 = vld [vmem:[%s3974_s2 + $0x30] sm:$0xff] }
  0x22   : > { %2503 = vmatprep.mubr.f32.mxu0 %v537_v56 }
  0x23   : > { %v606_v53 = vsub.f32 %v3479_v8, %v605_v44  ;;  %v597_v54 = vand.u32 4294901760, %v596_v49  ;;  %v250_v49 = vld [vmem:[%s3974_s2 + $0x40] sm:$0xff] }
  0x25   : > { %2504 = vmatmul.mubr.f32.gmra.mrb[8].mxu0 %v547_v0  ;;  %v607_v56 = vand.u32 4294901760, %v606_v53  ;;  %v3211_v0 = vmov 0   ;;  %v252_v53 = vld [vmem:[%s3974_s2 + $0x50] sm:$0xff] }
  0x26   : > { %2506 = vmatprep.mubr.f32.mxu0 %v557_v11  ;;  %3145 = vset.pattern.permute.xlu0 %v3211_v0  ;;  %v245_v11 = vld [vmem:[%s3974_s2 + $0x18] sm:$0xff] }
  0x27   : > { %3146 = vset.pattern.permute.xlu1 %v3211_v0  ;;  %v257_v0 = vld [vmem:[%s3974_s2 + $0x78] sm:$0xff] }
  0x28   : > { %270 = vperm.xlu1 %3146, %v244_v61   ;;  %v256_v61 = vld [vmem:[%s3974_s2 + $0x70] sm:$0xff] }
  0x29   : > { %2507 = vmatmul.mubr.f32.gmra.mrb[10].mxu0 %v567_v17  ;;  %v247_v17 = vld [vmem:[%s3974_s2 + $0x28] sm:$0xff] }
  0x2a   : > { %2509 = vmatprep.mubr.f32.mxu0 %v577_v45  ;;  %v249_v45 = vld [vmem:[%s3974_s2 + $0x38] sm:$0xff] }
  0x2c   : > { %275 = vperm.xlu1 %3146, %v245_v11  }
  0x2d   : > { %2510 = vmatmul.mubr.f32.gmra.mrb[12].mxu0 %v587_v52  ;;  %v251_v52 = vld [vmem:[%s3974_s2 + $0x48] sm:$0xff] }
  0x2e   : > { %2512 = vmatprep.mubr.f32.mxu0 %v597_v54  ;;  %v253_v54 = vld [vmem:[%s3974_s2 + $0x58] sm:$0xff] }
  0x30   : > { %285 = vperm.xlu1 %3146, %v247_v17  }
  0x31   : > { %2513 = vmatmul.mubr.f32.gmra.mrb[14].mxu0 %v607_v56  ;;  %v254_v56 = vld [vmem:[%s3974_s2 + $0x60] sm:$0xff] }
  0x32   : > { %2517 = vmatprep.mubr.f32.mxu0 %v3293_v9 }
  0x34   : > { %295 = vperm.xlu1 %3146, %v249_v45  }
  0x35   : > { %2518 = vmatmul.mubr.f32.vlgmr.msra.gmra.mrb[0].mxu0 %v3295_v10 }
  0x36   : > { %2542 = vmatpush3.msra.mxu0 %v3304_v14  ;;  %2520 = vmatprep.mubr.f32.mxu0 %v3306_v15  ;;  %v242_v14 = vld [vmem:[%s3974_s2] sm:$0xff] }
  0x37   : > { %2567 = vmatprep.subr.mxu0 %v3280_v3  ;;  %260 = vperm.xlu0 %3145, %v242_v14   ;;  %v255_v14 = vld [vmem:[%s3974_s2 + $0x68] sm:$0xff] }
  0x38   : > { %305 = vperm.xlu1 %3146, %v251_v52  }
  0x39   : > { %2521 = vmatmul.mubr.f32.gmra.mrb[2].mxu0 %v3308_v16 }
  0x3a   : > { %2523 = vmatprep.mubr.f32.mxu0 %v3321_v21 }
  0x3b   : > { %265 = vperm.xlu0 %3145, %v243_v1   ;;  %v1495_v1 = vld [vmem:[%s3976_s4] sm:$0xff] }
  0x3c   : > { %315 = vperm.xlu1 %3146, %v253_v54  }
  0x3d   : > { %2524 = vmatmul.mubr.f32.gmra.mrb[4].mxu0 %v3333_v26 }
  0x3e   : > { %2526 = vmatprep.mubr.f32.mxu0 %v3355_v38 }
  0x3f   : > { %280 = vperm.xlu0 %3145, %v246_v12  }
  0x40   : > { %325 = vperm.xlu1 %3146, %v255_v14  }
  0x41   : > { %2527 = vmatmul.mubr.f32.gmra.mrb[6].mxu0 %v3390_v58 }
  0x42   : > { %2529 = vmatprep.mubr.f32.mxu0 %v3399_v63 }
  0x43   : > { %290 = vperm.xlu0 %3145, %v248_v40  }
  0x44   : > { %335 = vperm.xlu1 %3146, %v257_v0  }
  0x45   : > { %2530 = vmatmul.mubr.f32.gmra.mrb[8].mxu0 %v3409_v5 }
  0x46   : > { %2532 = vmatprep.mubr.f32.mxu0 %v3411_v6 }
  0x47   : > { %300 = vperm.xlu0 %3145, %v250_v49  }
  0x49   : > { %2533 = vmatmul.mubr.f32.gmra.mrb[10].mxu0 %v3431_v35 }
  0x4a   : > { %2535 = vmatprep.mubr.f32.mxu0 %v3433_v36 }
  0x4b   : > { %310 = vperm.xlu0 %3145, %v252_v53  }
  0x4d   : > { %2536 = vmatmul.mubr.f32.gmra.mrb[12].mxu0 %v3435_v39 }
  0x4e   : > { %2538 = vmatprep.mubr.f32.mxu0 %v3458_v51 }
  0x4f   : > { %320 = vperm.xlu0 %3145, %v254_v56  }
  0x51   : > { %2539 = vmatmul.mubr.f32.gmra.mrb[14].mxu0 %v3472_v62 }
  0x52   : > { %2543 = vmatprep.mubr.f32.mxu0 %v3316_v19  ;;  %v1494_v19 = vld [vmem:[%s3975_s3] sm:$0xff] }
  0x53   : > { %330 = vperm.xlu0 %3145, %v256_v61  }
  0x55   : > { %2544 = vmatmul.mubr.f32.vlgmr.msra.gmra.mrb[0].mxu0 %v3319_v20 }
  0x56   : > { %2568 = vmatpush3.msra.mxu0 %v3280_v3  ;;  %2546 = vmatprep.mubr.f32.mxu0 %v3328_v24 }
  0x57   : > { %2593 = vmatprep.subr.mxu0 %v3325_v23  ;;  %1498 = vperm.xlu0 %3145, %v1495_v1  }
  0x59   : > { %2547 = vmatmul.mubr.f32.gmra.mrb[2].mxu0 %v3331_v25 }
  0x5a   : > { %2549 = vmatprep.mubr.f32.mxu0 %v3338_v29 }
  0x5d   : > { %2550 = vmatmul.mubr.f32.gmra.mrb[4].mxu0 %v3346_v34 }
  0x5e   : > { %2552 = vmatprep.mubr.f32.mxu0 %v3374_v48 }
  0x61   : > { %2553 = vmatmul.mubr.f32.gmra.mrb[6].mxu0 %v3407_v4 }
  0x62   : > { %2555 = vmatprep.mubr.f32.mxu0 %v3414_v7 }
  0x65   : > { %2556 = vmatmul.mubr.f32.gmra.mrb[8].mxu0 %v3425_v22 }
  0x66   : > { %2558 = vmatprep.mubr.f32.mxu0 %v3428_v30 }
  0x69   : > { %2559 = vmatmul.mubr.f32.gmra.mrb[10].mxu0 %v3447_v46 }
  0x6a   : > { %2561 = vmatprep.mubr.f32.mxu0 %v3450_v47 }
  0x6d   : > { %2562 = vmatmul.mubr.f32.gmra.mrb[12].mxu0 %v3456_v50 }
  0x6e   : > { %2564 = vmatprep.mubr.f32.mxu0 %v3469_v60 }
  0x71   : > { %2565 = vmatmul.mubr.f32.gmra.mrb[14].mxu0 %v3479_v8 }
  0x72   : > { %2569 = vmatprep.mubr.f32.mxu0 %v455_v27 }
  0x75   : > { %2570 = vmatmul.mubr.f32.vlgmr.msra.gmra.mrb[0].mxu0 %v465_v28 }
  0x76   : > { %2594 = vmatpush3.msra.mxu0 %v3325_v23  ;;  %2572 = vmatprep.mubr.f32.mxu0 %v475_v32 }
  0x77   : > { %2619 = vmatprep.subr.mxu0 %v3280_v3 }
  0x79   : > { %2573 = vmatmul.mubr.f32.gmra.mrb[2].mxu0 %v485_v33 }
  0x7a   : > { %2575 = vmatprep.mubr.f32.mxu0 %v495_v37 }
  0x7d   : > { %2576 = vmatmul.mubr.f32.gmra.mrb[4].mxu0 %v505_v43 }
  0x7e   : > { %2578 = vmatprep.mubr.f32.mxu0 %v515_v57 }
  0x81   : > { %2579 = vmatmul.mubr.f32.gmra.mrb[6].mxu0 %v525_v18 }
  0x82   : > { %2581 = vmatprep.mubr.f32.mxu0 %v535_v31 }
  0x85   : > { %2582 = vmatmul.mubr.f32.gmra.mrb[8].mxu0 %v545_v41 }
  0x86   : > { %2584 = vmatprep.mubr.f32.mxu0 %v555_v42 }
  0x89   : > { %2585 = vmatmul.mubr.f32.gmra.mrb[10].mxu0 %v565_v55 }
  0x8a   : > { %2587 = vmatprep.mubr.f32.mxu0 %v575_v59 }
  0x8d   : > { %2588 = vmatmul.mubr.f32.gmra.mrb[12].mxu0 %v585_v2 }
  0x8e   : > { %2590 = vmatprep.mubr.f32.mxu0 %v595_v13 }
  0x91   : > { %2591 = vmatmul.mubr.f32.gmra.mrb[14].mxu0 %v605_v44 }
  0x92   : > { %2595 = vmatprep.mubr.f32.mxu0 %v3293_v9 }
  0x95   : > { %2596 = vmatmul.mubr.f32.vlgmr.msra.gmra.mrb[0].mxu0 %v3295_v10 }
  0x96   : > { %2620 = vmatpush3.msra.mxu0 %v3280_v3  ;;  %2598 = vmatprep.mubr.f32.mxu0 %v3306_v15  ;;  %v3212_v3 = vmov 0.0|0.0  }
  0x97   : > { %2855 = vmatprep.subr.bf16.mxu1 %v3212_v3 }
  0x99   : > { %2599 = vmatmul.mubr.f32.gmra.mrb[2].mxu0 %v3308_v16 }
  0x9a   : > { %2601 = vmatprep.mubr.f32.mxu0 %v3321_v21 }
  0x9d   : > { %2602 = vmatmul.mubr.f32.gmra.mrb[4].mxu0 %v3333_v26 }
  0x9e   : > { %2604 = vmatprep.mubr.f32.mxu0 %v3355_v38 }
  0xa1   : > { %2605 = vmatmul.mubr.f32.gmra.mrb[6].mxu0 %v3390_v58 }
  0xa2   : > { %2607 = vmatprep.mubr.f32.mxu0 %v3399_v63 }
  0xa5   : > { %2608 = vmatmul.mubr.f32.gmra.mrb[8].mxu0 %v3409_v5 }
  0xa6   : > { %2610 = vmatprep.mubr.f32.mxu0 %v3411_v6 }
  0xa9   : > { %2611 = vmatmul.mubr.f32.gmra.mrb[10].mxu0 %v3431_v35 }
  0xaa   : > { %2613 = vmatprep.mubr.f32.mxu0 %v3433_v36 }
  0xad   : > { %2614 = vmatmul.mubr.f32.gmra.mrb[12].mxu0 %v3435_v39 }
  0xae   : > { %2616 = vmatprep.mubr.f32.mxu0 %v3458_v51 }
  0xb1   : > { %2617 = vmatmul.mubr.f32.gmra.mrb[14].mxu0 %v3472_v62 }
  0xb2   : > { %2621 = vmatprep.mubr.f32.mxu0 %v3293_v9  ;;  %v3979_v9 = vmov 0.0  }
  0xb3   : > { %2677 = vmatprep.mubr.msk.f32.mxu1 %vm3213_vm1, %v3979_v9 }
  0xb5   : > { %2622 = vmatmul.mubr.f32.vlgmr.msra.gmra.mrb[0].mxu0 %v3295_v10  ;;  %v271_v10 = vpop.permute.xlu1 %270 }
  0xb6   : > { %2624 = vmatprep.mubr.f32.mxu0 %v3306_v15  ;;  %v261_v15 = vpop.permute.xlu0 %260 }
  0xb9   : > { %2625 = vmatmul.mubr.f32.gmra.mrb[2].mxu0 %v3308_v16  ;;  %v276_v16 = vpop.permute.xlu1 %275 }
  0xba   : > { %2627 = vmatprep.mubr.f32.mxu0 %v3321_v21  ;;  %v266_v20 = vpop.permute.xlu0 %265  ;;  %v3655_v21 = vand.u32 4294901760, %v1494_v19 }
  0xbc   : > { %v3658_v25 = vsub.f32 %v1494_v19, %v3655_v21 }
  0xbd   : > { %2628 = vmatmul.mubr.f32.gmra.mrb[4].mxu0 %v3333_v26  ;;  %v286_v23 = vpop.permute.xlu1 %285 }
  0xbe   : > { %2630 = vmatprep.mubr.f32.mxu0 %v3355_v38  ;;  %v281_v24 = vpop.permute.xlu0 %280  ;;  %v3978_v33 = vand.u32 4294901760, %v3658_v25 }
  0xc0   : > { %v3666_v7 = vsub.f32 %v3658_v25, %v3978_v33 }
  0xc1   : > { %2631 = vmatmul.mubr.f32.gmra.mrb[6].mxu0 %v3390_v58  ;;  %v296_v34 = vpop.permute.xlu1 %295 }
  0xc2   : > { %2633 = vmatprep.mubr.f32.mxu0 %v3399_v63  ;;  %v291_v43 = vpop.permute.xlu0 %290 }
  0xc5   : > { %2634 = vmatmul.mubr.f32.gmra.mrb[8].mxu0 %v3409_v5  ;;  %v306_v42 = vpop.permute.xlu1 %305 }
  0xc6   : > { %2636 = vmatprep.mubr.f32.mxu0 %v3411_v6  ;;  %v301_v55 = vpop.permute.xlu0 %300 }
  0xc9   : > { %2637 = vmatmul.mubr.f32.gmra.mrb[10].mxu0 %v3431_v35 }
  0xca   : > { %2639 = vmatprep.mubr.f32.mxu0 %v3433_v36 }
  0xcd   : > { %2640 = vmatmul.mubr.f32.gmra.mrb[12].mxu0 %v3435_v39 }
  0xce   : > { %2642 = vmatprep.mubr.f32.mxu0 %v3458_v51 }
  0xd1   : > { %2643 = vmatmul.mubr.f32.gmra.mrb[14].mxu0 %v3472_v62 }
 0x188   : > { %v2623_v26 = vpop.f32.mrb[0].mxu0 }
 0x189   : > { %v2999_v27 = vadd.f32 %v2623_v26, %v266_v20  ;;  %v1384_v28 = vpop.f32.mrb[1].mxu0  ;;  %v311_v26 = vpop.permute.xlu0 %310 }
 0x18a   : > { %v3000_v29 = vadd.f32 %v1384_v28, %v261_v15  ;;  %v316_v15 = vpop.permute.xlu1 %315 }
 0x18b   : > { %v1479_v32 = vmax.f32 %v2999_v27, 0.0 }
 0x18c   : > { %v1478_v37 = vmax.f32 %v3000_v29, 0.0  ;;  %v2626_v38 = vpop.f32.mrb[2].mxu0 }
 0x18d   : > { %v1505_v48 = vand.u32 4294901760, %v1479_v32  ;;  %v3001_v57 = vadd.f32 %v2626_v38, %v276_v16  ;;  %v1396_v58 = vpop.f32.mrb[3].mxu0 }
 0x18e   : > { %v1502_v63 = vand.u32 4294901760, %v1478_v37  ;;  %v3002_v4 = vadd.f32 %v1396_v58, %v271_v10 }
 0x18f   : > { %v3661_v5 = vsub.f32 %v1479_v32, %v1505_v48  ;;  %v1481_v6 = vmax.f32 %v3001_v57, 0.0 }
 0x190   : > { %v3668_v18 = vsub.f32 %v1478_v37, %v1502_v63  ;;  %v1480_v22 = vmax.f32 %v3002_v4, 0.0  ;;  %v2629_v30 = vpop.f32.mrb[4].mxu0  ;;  %v3670_v31 = vpack.c.bf16 %v1505_v48, %v1502_v63 }
 0x191   : > { %v1602_v35 = vand.u32 4294901760, %v3661_v5  ;;  %v1511_v36 = vand.u32 4294901760, %v1481_v6  ;;  %v3003_v39 = vadd.f32 %v2629_v30, %v286_v23  ;;  %v1408_v41 = vpop.f32.mrb[5].mxu0 }
 0x192   : > { %v1595_v46 = vand.u32 4294901760, %v3668_v18  ;;  %v1508_v47 = vand.u32 4294901760, %v1480_v22  ;;  %v3004_v50 = vadd.f32 %v1408_v41, %v281_v24  ;;  %2857 = vmatpush3.bf16.msra.mxu1 %v3670_v31 }
 0x193   : > { %v1603_v59 = vsub.f32 %v3661_v5, %v1602_v35  ;;  %v3680_v60 = vsub.f32 %v1481_v6, %v1511_v36  ;;  %v1483_v62 = vmax.f32 %v3003_v39, 0.0  ;;  %2858 = vmatprep.subr.bf16.mxu1 %v3212_v3 }
 0x194   : > { %v1596_v8 = vsub.f32 %v3668_v18, %v1595_v46  ;;  %v3687_v13 = vsub.f32 %v1480_v22, %v1508_v47  ;;  %v1482_v44 = vmax.f32 %v3004_v50, 0.0  ;;  %v2632_v11 = vpop.f32.mrb[6].mxu0  ;;  %v3689_v12 = vpack.c.bf16 %v1511_v36, %v1508_v47 }
 0x195   : > { %v1604_v17 = vand.u32 4294901760, %v1603_v59  ;;  %v1616_v40 = vand.u32 4294901760, %v3680_v60  ;;  %v1517_v45 = vand.u32 4294901760, %v1483_v62  ;;  %v3005_v49 = vadd.f32 %v2632_v11, %v296_v34  ;;  %v1420_v52 = vpop.f32.mrb[7].mxu0  ;;  %v326_v59 = vpop.permute.xlu1 %325 }
 0x196   : > { %v1597_v53 = vand.u32 4294901760, %v1596_v8  ;;  %v1609_v54 = vand.u32 4294901760, %v3687_v13  ;;  %v1514_v56 = vand.u32 4294901760, %v1482_v44  ;;  %v3006_v14 = vadd.f32 %v1420_v52, %v291_v43  ;;  %2860 = vmatpush3.bf16.msra.mxu1 %v3689_v12 }
 0x197   : > { %v1617_v61 = vsub.f32 %v3680_v60, %v1616_v40  ;;  %v3697_v0 = vsub.f32 %v1483_v62, %v1517_v45  ;;  %v1485_v1 = vmax.f32 %v3005_v49, 0.0  ;;  %2861 = vmatprep.subr.bf16.mxu1 %v3212_v3 }
 0x198   : > { %v1610_v16 = vsub.f32 %v3687_v13, %v1609_v54  ;;  %v3705_v19 = vsub.f32 %v1482_v44, %v1514_v56  ;;  %v1484_v20 = vmax.f32 %v3006_v14, 0.0  ;;  %v2635_v23 = vpop.f32.mrb[8].mxu0  ;;  %v3707_v24 = vpack.c.bf16 %v1517_v45, %v1514_v56 }
 0x199   : > { %v1618_v27 = vand.u32 4294901760, %v1617_v61  ;;  %v1630_v28 = vand.u32 4294901760, %v3697_v0  ;;  %v1523_v29 = vand.u32 4294901760, %v1485_v1  ;;  %v3007_v32 = vadd.f32 %v2635_v23, %v306_v42  ;;  %v1432_v34 = vpop.f32.mrb[9].mxu0 }
 0x19a   : > { %v1611_v37 = vand.u32 4294901760, %v1610_v16  ;;  %v1623_v38 = vand.u32 4294901760, %v3705_v19  ;;  %v1520_v43 = vand.u32 4294901760, %v1484_v20  ;;  %v3008_v48 = vadd.f32 %v1432_v34, %v301_v55  ;;  %2863 = vmatpush3.bf16.msra.mxu1 %v3707_v24 }
 0x19b   : > { %v1631_v57 = vsub.f32 %v3697_v0, %v1630_v28  ;;  %v3715_v58 = vsub.f32 %v1485_v1, %v1523_v29  ;;  %v1487_v63 = vmax.f32 %v3007_v32, 0.0  ;;  %2864 = vmatprep.subr.bf16.mxu1 %v3212_v3  ;;  %v3718_v4 = vpack.c.bf16 %v1604_v17, %v1597_v53  ;;  %v321_v17 = vpop.permute.xlu0 %320 }
 0x19c   : > { %v1624_v6 = vsub.f32 %v3705_v19, %v1623_v38  ;;  %v3723_v22 = vsub.f32 %v1484_v20, %v1520_v43  ;;  %v1486_v30 = vmax.f32 %v3008_v48, 0.0  ;;  %v2638_v36 = vpop.f32.mrb[10].mxu0  ;;  %v3725_v39 = vpack.c.bf16 %v1523_v29, %v1520_v43 }
 0x19d   : > { %v1632_v41 = vand.u32 4294901760, %v1631_v57  ;;  %v1644_v42 = vand.u32 4294901760, %v3715_v58  ;;  %v1529_v47 = vand.u32 4294901760, %v1487_v63  ;;  %v3009_v50 = vadd.f32 %v2638_v36, %v316_v15  ;;  %v1444_v55 = vpop.f32.mrb[11].mxu0 }
 0x19e   : > { %v1625_v62 = vand.u32 4294901760, %v1624_v6  ;;  %v1637_v8 = vand.u32 4294901760, %v3723_v22  ;;  %v1526_v44 = vand.u32 4294901760, %v1486_v30  ;;  %v3010_v11 = vadd.f32 %v1444_v55, %v311_v26  ;;  %2866 = vmatpush3.bf16.msra.mxu1 %v3725_v39  ;;  %v336_v6 = vpop.permute.xlu1 %335 }
 0x19f   : > { %v1645_v45 = vsub.f32 %v3715_v58, %v1644_v42  ;;  %v3733_v49 = vsub.f32 %v1487_v63, %v1529_v47  ;;  %v1489_v52 = vmax.f32 %v3009_v50, 0.0  ;;  %2867 = vmatprep.subr.bf16.mxu1 %v3212_v3  ;;  %v3736_v53 = vpack.c.bf16 %v1618_v27, %v1611_v37 }
 0x1a0   : > { %v1638_v56 = vsub.f32 %v3723_v22, %v1637_v8  ;;  %v3741_v14 = vsub.f32 %v1486_v30, %v1526_v44  ;;  %v1488_v61 = vmax.f32 %v3010_v11, 0.0  ;;  %v2641_v1 = vpop.f32.mrb[12].mxu0  ;;  %v3743_v15 = vpack.c.bf16 %v1529_v47, %v1526_v44 }
 0x1a1   : > { %v1646_v16 = vand.u32 4294901760, %v1645_v45  ;;  %v3981_v20 = vand.u32 4294901760, %v3733_v49  ;;  %v1535_v23 = vand.u32 4294901760, %v1489_v52  ;;  %v3011_v26 = vadd.f32 %v2641_v1, %v326_v59  ;;  %v1456_v29 = vpop.f32.mrb[13].mxu0  ;;  %v331_v59 = vpop.permute.xlu0 %330 }
 0x1a2   : > { %v1639_v32 = vand.u32 4294901760, %v1638_v56  ;;  %v1651_v27 = vand.u32 4294901760, %v3741_v14  ;;  %v1532_v34 = vand.u32 4294901760, %v1488_v61  ;;  %v3012_v37 = vadd.f32 %v1456_v29, %v321_v17  ;;  %2869 = vmatpush3.bf16.msra.mxu1 %v3743_v15 }
 0x1a3   : > { %v1659_v43 = vsub.f32 %v3733_v49, %v3981_v20  ;;  %v3751_v48 = vsub.f32 %v1489_v52, %v1535_v23  ;;  %v1491_v57 = vmax.f32 %v3011_v26, 0.0  ;;  %2870 = vmatprep.subr.bf16.mxu1 %v3212_v3  ;;  %v3754_v63 = vpack.c.bf16 %v1632_v41, %v1625_v62 }
 0x1a4   : > { %v1652_v30 = vsub.f32 %v3741_v14, %v1651_v27  ;;  %v3759_v36 = vsub.f32 %v1488_v61, %v1532_v34  ;;  %v1490_v47 = vmax.f32 %v3012_v37, 0.0  ;;  %v2644_v50 = vpop.f32.mrb[14].mxu0  ;;  %v3761_v55 = vpack.c.bf16 %v1535_v23, %v1532_v34 }
 0x1a5   : > { %v1660_v44 = vand.u32 4294901760, %v1659_v43  ;;  %v1672_v11 = vand.u32 4294901760, %v3751_v48  ;;  %v1541_v17 = vand.u32 4294901760, %v1491_v57  ;;  %v3013_v45 = vadd.f32 %v2644_v50, %v336_v6  ;;  %v1468_v52 = vpop.f32.mrb[15].mxu0 }
 0x1a6   : > { %v1653_v41 = vand.u32 4294901760, %v1652_v30  ;;  %v1665_v62 = vand.u32 4294901760, %v3759_v36  ;;  %v1538_v56 = vand.u32 4294901760, %v1490_v47  ;;  %v3014_v1 = vadd.f32 %v1468_v52, %v331_v59  ;;  %2872 = vmatpush3.bf16.msra.mxu1 %v3761_v55 }
 0x1a7   : > { %v1673_v61 = vsub.f32 %v3751_v48, %v1672_v11  ;;  %v3767_v26 = vsub.f32 %v1491_v57, %v1541_v17  ;;  %v1493_v23 = vmax.f32 %v3013_v45, 0.0  ;;  %2873 = vmatprep.subr.bf16.mxu1 %v3212_v3  ;;  %v2889_v29 = vpack.c.bf16 %v1646_v16, %v1639_v32 }
 0x1a8   : > { %v1666_v34 = vsub.f32 %v3759_v36, %v1665_v62  ;;  %v3771_v37 = vsub.f32 %v1490_v47, %v1538_v56  ;;  %v1492_v43 = vmax.f32 %v3014_v1, 0.0  ;;  %v3773_v6 = vpack.c.bf16 %v1541_v17, %v1538_v56 }
 0x1a9   : > { %v1674_v30 = vand.u32 4294901760, %v1673_v61  ;;  %v1686_v50 = vand.u32 4294901760, %v3767_v26  ;;  %v1547_v59 = vand.u32 4294901760, %v1493_v23  ;;  %v2892_v52 = vpack.c.bf16 %v1660_v44, %v1653_v41 }
 0x1aa   : > { %v1667_v33 = vand.u32 4294901760, %v1666_v34  ;;  %v1679_v57 = vand.u32 4294901760, %v3771_v37  ;;  %v1544_v10 = vand.u32 4294901760, %v1492_v43  ;;  %2875 = vmatpush3.bf16.msra.mxu1 %v3773_v6  ;;  %v2910_v16 = vpack.c.bf16 %v3697_v0, %v3705_v19 }
 0x1ab   : > { %v1687_v32 = vsub.f32 %v3767_v26, %v1686_v50  ;;  %v3781_v47 = vsub.f32 %v1493_v23, %v1547_v59  ;;  %2876 = vmatprep.subr.bf16.mxu1 %v3212_v3  ;;  %v2913_v17 = vpack.c.bf16 %v3715_v58, %v3723_v22  ;;  %v2916_v44 = vpack.c.bf16 %v3733_v49, %v3741_v14 }
 0x1ac   : > { %v1680_v45 = vsub.f32 %v3771_v37, %v1679_v57  ;;  %v1692_v41 = vsub.f32 %v1492_v43, %v1544_v10  ;;  %v3789_v56 = vpack.c.bf16 %v1547_v59, %v1544_v10  ;;  %v2895_v1 = vpack.c.bf16 %v1674_v30, %v1667_v33 }
 0x1ad   : > { %v1688_v61 = vand.u32 4294901760, %v1687_v32  ;;  %v1700_v34 = vand.u32 4294901760, %v3781_v47  ;;  %v2919_v23 = vpack.c.bf16 %v3751_v48, %v3759_v36  ;;  %v2922_v51 = vpack.c.bf16 %v3767_v26, %v3771_v37 }
 0x1ae   : > { %v1681_v9 = vand.u32 4294901760, %v1680_v45  ;;  %v1693_v2 = vand.u32 4294901760, %v1692_v41  ;;  %2878 = vmatpush3.bf16.msra.mxu1 %v3789_v56  ;;  %v2925_v20 = vpack.c.bf16 %v3781_v47, %v1692_v41  ;;  %v3802_v33 = vpack.c.bf16 %v1602_v35, %v1595_v46 }
 0x1af   : > { %v1701_v10 = vsub.f32 %v3781_v47, %v1700_v34  ;;  %2879 = vmatprep.subr.bf16.mxu1 %v3212_v3  ;;  %v3810_v48 = vpack.c.bf16 %v1616_v40, %v1609_v54  ;;  %v3816_v36 = vpack.c.bf16 %v1630_v28, %v1623_v38  ;;  %v3822_v35 = vpack.c.bf16 %v1644_v42, %v1637_v8 }
 0x1b0   : > { %v1694_v46 = vsub.f32 %v1692_v41, %v1693_v2  ;;  %v2898_v26 = vpack.c.bf16 %v1688_v61, %v1681_v9  ;;  %v3982_v37 = vand.u32 4294901760, %v3733_v49  ;;  %v3830_v54 = vpack.c.bf16 %v1672_v11, %v1665_v62 }
 0x1b1   : > { %v1702_v19 = vand.u32 4294901760, %v1701_v10  ;;  %v3983_v0 = vand.u32 4294901760, %v3666_v7  ;;  %v3834_v28 = vpack.c.bf16 %v1686_v50, %v1679_v57  ;;  %v3836_v38 = vpack.c.bf16 %v1700_v34, %v1693_v2 }
 0x1b2   : > { %v3828_v40 = vpack.c.bf16 %v3982_v37, %v1651_v27  ;;  %v1695_v58 = vand.u32 4294901760, %v1694_v46  ;;  %v3984_v9 = vmov 0.0   ;;  %v3985_v7 = vpack.c.bf16 %v3661_v5, %v3668_v18 }
 0x1b3   : > { %2678 = vmatmul.mubr.f32.vlgmr.msra.gmra.mrb[0].mxu1 %v3983_v0  ;;  %v3986_v2 = vpack.c.bf16 %v3680_v60, %v3687_v13  ;;  %v3987_v5 = vand.u32 4294901760, %v3658_v25 }
 0x1b4   : > { %2881 = vmatpush3.bf16.msra.mxu1 %v3718_v4  ;;  %2712 = vmatprep.mubr.msk.f32.mxu1 %vm3213_vm1, %v3984_v9  ;;  %v2901_v22 = vpack.c.bf16 %v1702_v19, %v1695_v58 }
 0x1b5   : > { %2882 = vmatprep.subr.bf16.mxu1 %v3212_v3 }
 0x1b8   : > { %2884 = vmatpush3.bf16.msra.mxu1 %v3736_v53 }
 0x1b9   : > { %2885 = vmatprep.subr.bf16.mxu1 %v3212_v3 }
 0x1bc   : > { %2887 = vmatpush3.bf16.msra.mxu1 %v3754_v63 }
 0x1bd   : > { %2888 = vmatprep.subr.bf16.mxu1 %v3212_v3 }
 0x1c0   : > { %2890 = vmatpush3.bf16.msra.mxu1 %v2889_v29 }
 0x1c1   : > { %2891 = vmatprep.subr.bf16.mxu1 %v3212_v3 }
 0x1c4   : > { %2893 = vmatpush3.bf16.msra.mxu1 %v2892_v52 }
 0x1c5   : > { %2894 = vmatprep.subr.bf16.mxu1 %v3212_v3 }
 0x1c8   : > { %2896 = vmatpush3.bf16.msra.mxu1 %v2895_v1 }
 0x1c9   : > { %2897 = vmatprep.subr.bf16.mxu1 %v3212_v3 }
 0x1cc   : > { %2899 = vmatpush3.bf16.msra.mxu1 %v2898_v26 }
 0x1cd   : > { %2900 = vmatprep.subr.bf16.mxu1 %v3212_v3 }
 0x1d0   : > { %2902 = vmatpush3.bf16.msra.mxu1 %v2901_v22 }
 0x1d1   : > { %2903 = vmatprep.subr.bf16.mxu1 %v3212_v3 }
 0x1d3   : > { %2713 = vmatmul.mubr.f32.vlgmr.msra.gmra.mrb[0].mxu1 %v3655_v21 }
 0x1d4   : > { %2905 = vmatpush3.bf16.msra.mxu1 %v3985_v7  ;;  %2747 = vmatprep.mubr.msk.f32.mxu1 %vm3213_vm1, %v3984_v9 }
 0x1d5   : > { %2906 = vmatprep.subr.bf16.mxu1 %v3212_v3 }
 0x1d8   : > { %2908 = vmatpush3.bf16.msra.mxu1 %v3986_v2 }
 0x1d9   : > { %2909 = vmatprep.subr.bf16.mxu1 %v3212_v3 }
 0x1dc   : > { %2911 = vmatpush3.bf16.msra.mxu1 %v2910_v16 }
 0x1dd   : > { %2912 = vmatprep.subr.bf16.mxu1 %v3212_v3 }
 0x1e0   : > { %2914 = vmatpush3.bf16.msra.mxu1 %v2913_v17 }
 0x1e1   : > { %2915 = vmatprep.subr.bf16.mxu1 %v3212_v3 }
 0x1e4   : > { %2917 = vmatpush3.bf16.msra.mxu1 %v2916_v44 }
 0x1e5   : > { %2918 = vmatprep.subr.bf16.mxu1 %v3212_v3 }
 0x1e8   : > { %2920 = vmatpush3.bf16.msra.mxu1 %v2919_v23 }
 0x1e9   : > { %2921 = vmatprep.subr.bf16.mxu1 %v3212_v3 }
 0x1ec   : > { %2923 = vmatpush3.bf16.msra.mxu1 %v2922_v51 }
 0x1ed   : > { %2924 = vmatprep.subr.bf16.mxu1 %v3212_v3 }
 0x1f0   : > { %2926 = vmatpush3.bf16.msra.mxu1 %v2925_v20 }
 0x1f1   : > { %2927 = vmatprep.subr.bf16.mxu1 %v3212_v3 }
 0x1f3   : > { %2748 = vmatmul.mubr.f32.vlgmr.msra.gmra.mrb[0].mxu1 %v3658_v25  ;;  %v2142_v25 = vlaneseq }
 0x1f4   : > { %2929 = vmatpush3.bf16.msra.mxu1 %v3670_v31  ;;  %2782 = vmatprep.mubr.msk.f32.mxu1 %vm3213_vm1, %v3984_v9 }
 0x1f5   : > { %2930 = vmatprep.subr.bf16.mxu1 %v3212_v3  ;;  %v2143_v18 = vand.u32 127, %v2142_v25 }
 0x1f7   : > { %vm2147_vm2 = vcmp.lt.s32.totalorder %v2143_v18, 8 }
 0x1f8   : > { %2932 = vmatpush3.bf16.msra.mxu1 %v3689_v12 }
 0x1f9   : > { %2933 = vmatprep.subr.bf16.mxu1 %v3212_v3 }
 0x1fc   : > { %2935 = vmatpush3.bf16.msra.mxu1 %v3707_v24 }
 0x1fd   : > { %2936 = vmatprep.subr.bf16.mxu1 %v3212_v3 }
 0x200   : > { %2938 = vmatpush3.bf16.msra.mxu1 %v3725_v39 }
 0x201   : > { %2939 = vmatprep.subr.bf16.mxu1 %v3212_v3 }
 0x204   : > { %2941 = vmatpush3.bf16.msra.mxu1 %v3743_v15 }
 0x205   : > { %2942 = vmatprep.subr.bf16.mxu1 %v3212_v3 }
 0x208   : > { %2944 = vmatpush3.bf16.msra.mxu1 %v3761_v55 }
 0x209   : > { %2945 = vmatprep.subr.bf16.mxu1 %v3212_v3 }
 0x20c   : > { %2947 = vmatpush3.bf16.msra.mxu1 %v3773_v6 }
 0x20d   : > { %2948 = vmatprep.subr.bf16.mxu1 %v3212_v3 }
 0x210   : > { %2950 = vmatpush3.bf16.msra.mxu1 %v3789_v56 }
 0x211   : > { %2951 = vmatprep.subr.bf16.mxu1 %v3212_v3 }
 0x213   : > { %2783 = vmatmul.mubr.f32.vlgmr.msra.gmra.mrb[0].mxu1 %v3987_v5 }
 0x214   : > { %2953 = vmatpush3.bf16.msra.mxu1 %v3802_v33  ;;  %2817 = vmatprep.mubr.msk.f32.mxu1 %vm3213_vm1, %v3984_v9 }
 0x215   : > { %2954 = vmatprep.subr.bf16.mxu1 %v3212_v3 }
 0x218   : > { %2956 = vmatpush3.bf16.msra.mxu1 %v3810_v48 }
 0x219   : > { %2957 = vmatprep.subr.bf16.mxu1 %v3212_v3 }
 0x21c   : > { %2959 = vmatpush3.bf16.msra.mxu1 %v3816_v36 }
 0x21d   : > { %2960 = vmatprep.subr.bf16.mxu1 %v3212_v3 }
 0x220   : > { %2962 = vmatpush3.bf16.msra.mxu1 %v3822_v35 }
 0x221   : > { %2963 = vmatprep.subr.bf16.mxu1 %v3212_v3 }
 0x224   : > { %2965 = vmatpush3.bf16.msra.mxu1 %v3828_v40 }
 0x225   : > { %2966 = vmatprep.subr.bf16.mxu1 %v3212_v3 }
 0x228   : > { %2968 = vmatpush3.bf16.msra.mxu1 %v3830_v54 }
 0x229   : > { %2969 = vmatprep.subr.bf16.mxu1 %v3212_v3 }
 0x22c   : > { %2971 = vmatpush3.bf16.msra.mxu1 %v3834_v28 }
 0x22d   : > { %2972 = vmatprep.subr.bf16.mxu1 %v3212_v3 }
 0x230   : > { %2974 = vmatpush3.bf16.msra.mxu1 %v3836_v38 }
 0x231   : > { %2975 = vmatprep.subr.bf16.mxu1 %v3212_v3 }
 0x233   : > { %2818 = vmatmul.mubr.f32.vlgmr.msra.gmra.mrb[0].mxu1 %v3655_v21 }
 0x234   : > { %2977 = vmatpush3.bf16.msra.mxu1 %v3670_v31  ;;  %2852 = vmatprep.mubr.msk.f32.mxu1 %vm3213_vm1, %v3984_v9  ;;  %v1499_v31 = vpop.permute.xlu0 %1498 }
 0x235   : > { %2978 = vmatprep.subr.bf16.mxu1 %v3212_v3 }
 0x238   : > { %2980 = vmatpush3.bf16.msra.mxu1 %v3689_v12 }
 0x239   : > { %2981 = vmatprep.subr.bf16.mxu1 %v3212_v3 }
 0x23c   : > { %2983 = vmatpush3.bf16.msra.mxu1 %v3707_v24  ;;  %v3215_v24 = vmov (!%p2279_p4), -inf  }
 0x23d   : > { %2984 = vmatprep.subr.bf16.mxu1 %v3212_v3  ;;  %2157 = vst.msk [vmem:[#allocation2] sm:$0xff] (!%p2279_p4), %vm2156_vm3, %v3215_v24 }
 0x240   : > { %2986 = vmatpush3.bf16.msra.mxu1 %v3725_v39 }
 0x241   : > { %2987 = vmatprep.subr.bf16.mxu1 %v3212_v3 }
 0x244   : > { %2989 = vmatpush3.bf16.msra.mxu1 %v3743_v15  ;;  %v2162_v4 = vld [vmem:[#allocation2] sm:$0xff] (!%p2279_p4) }
 0x245   : > { %2990 = vmatprep.subr.bf16.mxu1 %v3212_v3 }
 0x248   : > { %2992 = vmatpush3.bf16.msra.mxu1 %v3761_v55 }
 0x249   : > { %2993 = vmatprep.subr.bf16.mxu1 %v3212_v3 }
 0x24c   : > { %2995 = vmatpush3.bf16.msra.mxu1 %v3773_v6 }
 0x24d   : > { %2996 = vmatprep.subr.bf16.mxu1 %v3212_v3  ;;  %v3216_v3 = vmov (!%p2279_p4), 0  }
 0x24e   : > { %3147 = vset.pattern.permute.xlu0 (!%p2279_p4), %v3216_v3 }
 0x250   : > { %2998 = vmatpush3.bf16.msra.mxu1 %v3789_v56 }
 0x253   : > { %2853 = vmatmul.mubr.f32.vlgmr.msra.gmra.mrb[0].mxu1 %v3655_v21  ;;  %v3217_v21 = vmov (!%p2279_p4), 0.0  }
 0x254   : > { %2158 = vst.msk [vmem:[#allocation3] sm:$0xff] (!%p2279_p4), %vm2156_vm3, %v3217_v21  ;;  %2186 = vst [vmem:[#allocation4] sm:$0x3] (!%p2279_p4), %v3217_v21 }
 0x25b   : > { %v2175_v55 = vld [vmem:[#allocation3] sm:$0xff] (!%p2279_p4) }
 0x321   : > { %2151 = sbr.rel (%p2279_p4) target bundleno = 1243 (0x4db), region = 44 }
 0x326   : > { %v2138_v51 = vpop.f32.mrb[0].mxu1 }
 0x327   : > { %v3015_v60 = vadd.f32 %v2138_v51, %v1499_v31  ;;  %v2854_v13 = vpop.f32.mrb[1].mxu1 }
 0x329   : > { %v2161_v12 = vsel %vm2147_vm2, %v3015_v60, -inf }
 0x32a   : > { %2163 = vmax.xlane.f32.xlu0 %v2161_v12 }
 0x3b7   : > { %v2164_v39 = vpop.xlane.xlu0 %2163 }
 0x3b8   : > { %v2165_v42 = vmax.f32 %v2162_v4, %v2164_v39 }
 0x3ba   : > { %v2176_v8 = vsub.f32 %v2162_v4, %v2165_v42  ;;  %2185 = vst.msk [vmem:[#allocation2] sm:$0xff] %vm2156_vm3, %v2165_v42  ;;  %2168 = vperm.xlu0 %3147, %v2165_v42  }
 0x3bc   : > { %v2177_v27 = vmul.f32 1.442695, %v2176_v8 }
 0x439   : > { %v2169_v49 = vpop.permute.xlu0 %2168 }
 0x43a   : > { %v2171_v53 = vsub.f32 %v3015_v60, %v2169_v49 }
 0x43c   : > { %v2172_v14 = vmul.f32 1.442695, %v2171_v53 }
 0x43e   : > { %3148 = vpow2.f32 %v2172_v14 }
 0x43f   : > { %3150 = vpow2.f32 %v2177_v27 }
 0x448   : > { %v3149_v15 = vpop.eup %3148 }
 0x449   : > { %v2174_v20 = vsel %vm2147_vm2, %v3149_v15, 0.0  ;;  %v3151_v63 = vpop.eup %3150 }
 0x44a   : > { %2180 = vadd.xlane.f32.xlu1 %v2174_v20  ;;  %v2179_v11 = vmul.f32 %v3151_v63, %v2175_v55 }
 0x4d7   : > { %v2181_v62 = vpop.xlane.xlu1 %2180 }
 0x4d8   : > { %v2182_v29 = vadd.f32 %v2181_v62, %v2179_v11 }
 0x4da   : > { %2184 = vst.msk [vmem:[#allocation3] sm:$0xff] %vm2156_vm3, %v2182_v29 }
 0x4db PF: > { %p2280_p5 = scmp.ne.s32.totalorder %s3201_s18, 1 }
 0x4dc   : > { %v2194_v43 = vld [vmem:[#allocation2] sm:$0xff] (!%p2280_p5)  ;;  %v3218_v30 = vmov (!%p2280_p5), 0  }
 0x4dd   : > { %2190 = sbr.rel (%p2280_p5) target bundleno = 1393 (0x571), region = 52  ;;  %3152 = vset.pattern.permute.xlu0 (!%p2280_p5), %v3218_v30 }
 0x4de   : > { %2197 = vperm.xlu0 (!%p2280_p5), %3152, %v2194_v43  }
 0x4e1   : > { %v2191_v6 = vld [vmem:[#allocation3] sm:$0xff] (!%p2280_p5) }
 0x4e2   : > { %3153 = vrcp.f32 (!%p2280_p5), %v2191_v6 }
 0x4ec   : > { %v3154_v50 = vpop.eup %3153 }
 0x4ed   : > { %2205 = vperm.xlu0 %3152, %v3154_v50  }
 0x55d   : > { %v2198_v59 = vpop.permute.xlu0 %2197 }
 0x55e   : > { %v2200_v52 = vsub.f32 %v3015_v60, %v2198_v59 }
 0x560   : > { %v2201_v57 = vmul.f32 1.442695, %v2200_v52 }
 0x562   : > { %3155 = vpow2.f32 %v2201_v57 }
 0x56c   : > { %v3156_v16 = vpop.eup %3155  ;;  %v2206_v32 = vpop.permute.xlu0 %2205 }
 0x56d   : > { %v2208_v47 = vmul.f32 %v3156_v16, %v2206_v32 }
 0x56f   : > { %v2211_v17 = vsel %vm2147_vm2, %v2208_v47, 0.0 }
 0x570   : > { %2212 = vst [vmem:[#allocation4] sm:$0x3] %v2211_v17 }
 0x571 PF: > { %p3937_p6 = scmp.eq.s32.totalorder %s2275_s21, 1  ;;  %s3219_s8 = smov [#allocation4]  }
 0x572   : > { %s2222_s9 = sshll.u32 %s3219_s8, 4  ;;  %s2223_s9 = int_to_ptr.vmem [resolvable:$true] %s2222_s9 }
 0x573   : > { %s3157_s10 = scalar_lea.vmem %s2223_s9, 32  ;;  %p3164_p10 = scmp.lt.s32.totalorder %s2223_s9, %s2223_s9 }
 0x574   : > { %p3158_p7 = scmp.ne.s32.totalorder %s2223_s9, %s3157_s10  ;;  %p3165_p11 = scmp.lt.s32.totalorder %s3157_s10, %s3157_s10 }
 0x576   : > { %p3159_p8 = pnand %p3158_p7, %p3937_p6  ;;  %p3166_p12 = por %p3165_p11, %p3164_p10 }
 0x578   : > { %p3160_p9 = pneg %p3159_p8 }
 0x57a   : > { %p3167_p13 = pnand %p3166_p12, %p3160_p9 }
 0x57c   : > { %3170 = shalt.err (!%p3167_p13)
}
 0x57d   : > { %s3171_s21 = scalar_lea.hbm %s3977_s5, 32 }
 0x57e   : > { %p3172_p0 = scmp.ne.s32.totalorder %s3977_s5, %s3171_s21  ;;  %p3177_p3 = scmp.lt.u32.totalorder %s3171_s21, %s3977_s5 }
 0x580   : > { %p3173_p1 = pnand %p3172_p0, %p3937_p6 }
 0x582   : > { %p3174_p2 = pneg %p3173_p1 }
 0x584   : > { %p3179_p4 = pnand %p3177_p3, %p3174_p2 }
 0x586   : > { %3182 = shalt.err (!%p3179_p4)
}
 0x587   : > { %3107 = dma.vmem_to_hbm [thread:$0]  (%p3937_p6), %s2223_s9, 32, %s3977_s5, [#allocation5]  }
 0x588   : > { %3196 = dma.done.wait (%p3937_p6), [#allocation5], 32  }
 0x589   : > { %3198 = vsyncadd (%p3937_p6), [#allocation5], 4294967264 }
 0x58a PF: > { %s16_s20 = sadd.s32 1, %s3209_s20   ;;  %s3989_s18 = smov %s3205_s19 }
 0x58b   : > { %p13_p5 = scmp.ge.s32.totalorder %s16_s20, 4   ;;  %s3990_s19 = smov %s3992_s22 }
 0x58d   :  { %15 = sbr.rel (!%p13_p5) target bundleno = 2 (0x2), region = 80 }
 0x594   :  { %2235 = vsyncpa [#allocation5], 1 }
 0x595   :  { %2237 = vsyncpa [#allocation5 + $0x1], 1 }

</bundles_post_ra>
